<compile_context>
chip_gen: v6e
topology: v6e:2x2x1
jax: 0.10.0
libtpu: 0.0.40
codegen_flags: <defaults>
</compile_context>

<pallas_src>
import functools

import jax
import jax.numpy as jnp
from jax.experimental import pallas as pl
from jax.experimental.pallas import tpu as pltpu


def _pinn_kernel(xt_ref, w1_ref, b1_ref, w2_ref, b2_ref, w3_ref, b3_ref,
                 w4_ref, b4_ref, o_ref):
    # xt_ref: (2, bn)  -- batch on lanes.
    x0 = xt_ref[0:1, :]                          # (1, bn)
    x1 = xt_ref[1:2, :]                          # (1, bn)

    # Layer 1 on the VPU: a K=2 matmul wastes an MXU pass, so do two
    # broadcast multiply-adds instead.  w1: (50, 2), b1: (50, 1).
    w1 = w1_ref[...]
    h = jnp.tanh(w1[:, 0:1] * x0 + w1[:, 1:2] * x1 + b1_ref[...])   # (50, bn)

    # Layers 2 & 3 on the MXU (50x50 @ 50xbn), f32 accumulation.
    h = jnp.tanh(
        jnp.dot(w2_ref[...], h, preferred_element_type=jnp.float32)
        + b2_ref[...])
    h = jnp.tanh(
        jnp.dot(w3_ref[...], h, preferred_element_type=jnp.float32)
        + b3_ref[...])

    # Layer 4: (1, 50) @ (50, bn) -> (1, bn).  Result is already lane-dense,
    # so the store below is a full-width (unmasked) vector store.
    out = (jnp.dot(w4_ref[...], h, preferred_element_type=jnp.float32)
           + b4_ref[...])

    o_ref[...] = out.astype(o_ref.dtype)


@functools.partial(jax.jit, static_argnames=("block_n",))
def pinn_forward(x, params, block_n=1024):
    """x: [N, 2] float32 -> [N, 1] float32."""
    w1, b1, w2, b2, w3, b3, w4, b4 = params
    n, d_in = x.shape
    assert d_in == 2
    assert block_n % 128 == 0

    # Effective tile: as large as requested, but no bigger than the padded
    # batch (multiple of 128 so the lane dim of every block stays aligned).
    bn = min(block_n, pl.cdiv(n, 128) * 128)
    n_pad = pl.cdiv(n, bn) * bn

    # Batch on lanes: transpose once outside the kernel (tiny: 2*N floats).
    xt = x.T                                              # (2, N)
    if n_pad != n:
        xt = jnp.pad(xt, ((0, 0), (0, n_pad - n)))

    grid = (n_pad // bn,)

    def full_spec(shape):
        return pl.BlockSpec(shape, lambda i: (0, 0))

    # Advisory cost hint so XLA can overlap this small call with neighbors.
    flops = (2 * 2 * 50 + 2 * 50 * 50 + 2 * 50 * 50 + 2 * 50) * n_pad
    transcendentals = 150 * n_pad
    weight_bytes = 4 * (50 * 2 + 50 + 50 * 50 + 50 + 50 * 50 + 50 + 50 + 1)
    bytes_accessed = 12 * n_pad + weight_bytes

    out = pl.pallas_call(
        _pinn_kernel,
        out_shape=jax.ShapeDtypeStruct((1, n_pad), jnp.float32),
        grid=grid,
        in_specs=[
            pl.BlockSpec((2, bn), lambda i: (0, i)),       # x^T tile
            full_spec(w1.shape), full_spec(b1.shape),
            full_spec(w2.shape), full_spec(b2.shape),
            full_spec(w3.shape), full_spec(b3.shape),
            full_spec(w4.shape), full_spec(b4.shape),
        ],
        out_specs=pl.BlockSpec((1, bn), lambda i: (0, i)), # lane-dense output
        compiler_params=pltpu.CompilerParams(
            dimension_semantics=("parallel",)),
        cost_estimate=pl.CostEstimate(
            flops=flops,
            transcendentals=transcendentals,
            bytes_accessed=bytes_accessed),
    )(xt, w1, b1, w2, b2, w3, b3, w4, b4)

    return out[0, :n].reshape(n, 1)


def init_params(key):
    """PyTorch nn.Linear-style init: U[-1/sqrt(fan_in), 1/sqrt(fan_in)].

    Weights kept in PyTorch layout [out_features, in_features]; biases as
    column vectors [out_features, 1] for the transposed (batch-on-lanes)
    kernel formulation.
    """
    dims = [(2, 50), (50, 50), (50, 50), (50, 1)]
    params = []
    for fan_in, fan_out in dims:
        key, kw, kb = jax.random.split(key, 3)
        bound = 1.0 / (fan_in ** 0.5)
        w = jax.random.uniform(kw, (fan_out, fan_in), jnp.float32,
                               minval=-bound, maxval=bound)
        b = jax.random.uniform(kb, (fan_out, 1), jnp.float32,
                               minval=-bound, maxval=bound)
        params.extend([w, b])
    return tuple(params)


def reference_forward(x, params):
    """Pure-JAX reference of the PyTorch forward (x @ W^T + b per layer)."""
    w1, b1, w2, b2, w3, b3, w4, b4 = params
    h = jnp.tanh(x @ w1.T + b1.T)
    h = jnp.tanh(h @ w2.T + b2.T)
    h = jnp.tanh(h @ w3.T + b3.T)
    return h @ w4.T + b4.T


if __name__ == "__main__":
    key = jax.random.PRNGKey(0)
    key, kx = jax.random.split(key)

    params = init_params(key)

    # Small batch of (x, t)-style 2D collocation points, as the PINN expects.
    N = 64
    x = jax.random.uniform(kx, (N, 2), jnp.float32, minval=-1.0, maxval=1.0)

    out = pinn_forward(x, params)
    out = jax.block_until_ready(out)

    ref = reference_forward(x, params)
    assert out.shape == (N, 1), out.shape
    assert jnp.allclose(out, ref, atol=1e-5, rtol=1e-5), (
        float(jnp.max(jnp.abs(out - ref))))

    print("KERNEL_OK")
</pallas_src>

<mosaic_0001>
module attributes {stable_mosaic.version = 11 : i64} {
  func.func @_pinn_kernel(%arg0: i32, %arg1: memref<2x128xf32, #tpu.memory_space<vmem>>, %arg2: memref<50x2xf32, #tpu.memory_space<vmem>>, %arg3: memref<50x1xf32, #tpu.memory_space<vmem>>, %arg4: memref<50x50xf32, #tpu.memory_space<vmem>>, %arg5: memref<50x1xf32, #tpu.memory_space<vmem>>, %arg6: memref<50x50xf32, #tpu.memory_space<vmem>>, %arg7: memref<50x1xf32, #tpu.memory_space<vmem>>, %arg8: memref<1x50xf32, #tpu.memory_space<vmem>>, %arg9: memref<1x1xf32, #tpu.memory_space<vmem>>, %arg10: memref<1x128xf32, #tpu.memory_space<vmem>>) attributes {dimension_semantics = [#tpu.dimension_semantics<parallel>], iteration_bounds = array<i64: 1>, scalar_prefetch = 0 : i64, scratch_operands = 0 : i64, tpu.core_type = #tpu.core_type<tc>, window_params = [{transform_indices = @transform_0, window_bounds = array<i64: 2, 128>}, {pipeline_mode = #tpu.pipeline_mode<synchronous>, transform_indices = @transform_1, window_bounds = array<i64: 50, 2>}, {pipeline_mode = #tpu.pipeline_mode<synchronous>, transform_indices = @transform_2, window_bounds = array<i64: 50, 1>}, {pipeline_mode = #tpu.pipeline_mode<synchronous>, transform_indices = @transform_3, window_bounds = array<i64: 50, 50>}, {pipeline_mode = #tpu.pipeline_mode<synchronous>, transform_indices = @transform_4, window_bounds = array<i64: 50, 1>}, {pipeline_mode = #tpu.pipeline_mode<synchronous>, transform_indices = @transform_5, window_bounds = array<i64: 50, 50>}, {pipeline_mode = #tpu.pipeline_mode<synchronous>, transform_indices = @transform_6, window_bounds = array<i64: 50, 1>}, {pipeline_mode = #tpu.pipeline_mode<synchronous>, transform_indices = @transform_7, window_bounds = array<i64: 1, 50>}, {pipeline_mode = #tpu.pipeline_mode<synchronous>, transform_indices = @transform_8, window_bounds = array<i64: 1, 1>}, {transform_indices = @transform_9, window_bounds = array<i64: 1, 128>}]} {
    %c0 = arith.constant 0 : index
    %c0_0 = arith.constant 0 : index
    %0 = vector.load %arg1[%c0, %c0_0] : memref<2x128xf32, #tpu.memory_space<vmem>>, vector<1x128xf32>
    %c1 = arith.constant 1 : index
    %c0_1 = arith.constant 0 : index
    %1 = vector.load %arg1[%c1, %c0_1] : memref<2x128xf32, #tpu.memory_space<vmem>>, vector<1x128xf32>
    %c0_2 = arith.constant 0 : index
    %c0_3 = arith.constant 0 : index
    %2 = vector.load %arg2[%c0_2, %c0_3] : memref<50x2xf32, #tpu.memory_space<vmem>>, vector<50x2xf32>
    %3 = vector.extract_strided_slice %2 {offsets = [0, 0], sizes = [50, 1], strides = [1, 1]} : vector<50x2xf32> to vector<50x1xf32>
    %4 = vector.broadcast %3 : vector<50x1xf32> to vector<50x128xf32>
    %5 = vector.broadcast %0 : vector<1x128xf32> to vector<50x128xf32>
    %6 = arith.mulf %4, %5 : vector<50x128xf32>
    %7 = vector.extract_strided_slice %2 {offsets = [0, 1], sizes = [50, 1], strides = [1, 1]} : vector<50x2xf32> to vector<50x1xf32>
    %8 = vector.broadcast %7 : vector<50x1xf32> to vector<50x128xf32>
    %9 = vector.broadcast %1 : vector<1x128xf32> to vector<50x128xf32>
    %10 = arith.mulf %8, %9 : vector<50x128xf32>
    %11 = arith.addf %6, %10 : vector<50x128xf32>
    %c0_4 = arith.constant 0 : index
    %c0_5 = arith.constant 0 : index
    %12 = vector.load %arg3[%c0_4, %c0_5] : memref<50x1xf32, #tpu.memory_space<vmem>>, vector<50x1xf32>
    %13 = vector.broadcast %12 : vector<50x1xf32> to vector<50x128xf32>
    %14 = arith.addf %11, %13 : vector<50x128xf32>
    %15 = math.tanh %14 : vector<50x128xf32>
    %c0_6 = arith.constant 0 : index
    %c0_7 = arith.constant 0 : index
    %16 = vector.load %arg4[%c0_6, %c0_7] : memref<50x50xf32, #tpu.memory_space<vmem>>, vector<50x50xf32>
    %cst = arith.constant dense<0.000000e+00> : vector<50x128xf32>
    %17 = tpu.matmul %16, %15, %cst {dimension_numbers = #tpu.dot_dimension_numbers<[1], [0], [0], [1], [0, 0, 1, 1], [], []>} : vector<50x50xf32>, vector<50x128xf32>, vector<50x128xf32> -> vector<50x128xf32>
    %c0_8 = arith.constant 0 : index
    %c0_9 = arith.constant 0 : index
    %18 = vector.load %arg5[%c0_8, %c0_9] : memref<50x1xf32, #tpu.memory_space<vmem>>, vector<50x1xf32>
    %19 = vector.broadcast %18 : vector<50x1xf32> to vector<50x128xf32>
    %20 = arith.addf %17, %19 : vector<50x128xf32>
    %21 = math.tanh %20 : vector<50x128xf32>
    %c0_10 = arith.constant 0 : index
    %c0_11 = arith.constant 0 : index
    %22 = vector.load %arg6[%c0_10, %c0_11] : memref<50x50xf32, #tpu.memory_space<vmem>>, vector<50x50xf32>
    %cst_12 = arith.constant dense<0.000000e+00> : vector<50x128xf32>
    %23 = tpu.matmul %22, %21, %cst_12 {dimension_numbers = #tpu.dot_dimension_numbers<[1], [0], [0], [1], [0, 0, 1, 1], [], []>} : vector<50x50xf32>, vector<50x128xf32>, vector<50x128xf32> -> vector<50x128xf32>
    %c0_13 = arith.constant 0 : index
    %c0_14 = arith.constant 0 : index
    %24 = vector.load %arg7[%c0_13, %c0_14] : memref<50x1xf32, #tpu.memory_space<vmem>>, vector<50x1xf32>
    %25 = vector.broadcast %24 : vector<50x1xf32> to vector<50x128xf32>
    %26 = arith.addf %23, %25 : vector<50x128xf32>
    %27 = math.tanh %26 : vector<50x128xf32>
    %c0_15 = arith.constant 0 : index
    %c0_16 = arith.constant 0 : index
    %28 = vector.load %arg8[%c0_15, %c0_16] : memref<1x50xf32, #tpu.memory_space<vmem>>, vector<1x50xf32>
    %cst_17 = arith.constant dense<0.000000e+00> : vector<1x128xf32>
    %29 = tpu.matmul %28, %27, %cst_17 {dimension_numbers = #tpu.dot_dimension_numbers<[1], [0], [0], [1], [0, 0, 1, 1], [], []>} : vector<1x50xf32>, vector<50x128xf32>, vector<1x128xf32> -> vector<1x128xf32>
    %c0_18 = arith.constant 0 : index
    %c0_19 = arith.constant 0 : index
    %30 = vector.load %arg9[%c0_18, %c0_19] : memref<1x1xf32, #tpu.memory_space<vmem>>, vector<1x1xf32>
    %31 = vector.broadcast %30 : vector<1x1xf32> to vector<1x128xf32>
    %32 = arith.addf %29, %31 : vector<1x128xf32>
    %c0_20 = arith.constant 0 : index
    %c0_21 = arith.constant 0 : index
    %33 = vector.load %arg10[%c0_20, %c0_21] : memref<1x128xf32, #tpu.memory_space<vmem>>, vector<1x128xf32>
    tpu.vector_store %arg10[%c0_20, %c0_21], %32 {strides = array<i32>} : memref<1x128xf32, #tpu.memory_space<vmem>>, vector<1x128xf32>,
    return
  }
  func.func @transform_0(%arg0: i32) -> (i32, i32) {
    %c0_i32 = arith.constant 0 : i32
    %c0_i32_0 = arith.constant 0 : i32
    return %c0_i32, %arg0 : i32, i32
  }
  func.func @transform_1(%arg0: i32) -> (i32, i32) {
    %c0_i32 = arith.constant 0 : i32
    %c0_i32_0 = arith.constant 0 : i32
    %c0_i32_1 = arith.constant 0 : i32
    return %c0_i32, %c0_i32_0 : i32, i32
  }
  func.func @transform_2(%arg0: i32) -> (i32, i32) {
    %c0_i32 = arith.constant 0 : i32
    %c0_i32_0 = arith.constant 0 : i32
    %c0_i32_1 = arith.constant 0 : i32
    return %c0_i32, %c0_i32_0 : i32, i32
  }
  func.func @transform_3(%arg0: i32) -> (i32, i32) {
    %c0_i32 = arith.constant 0 : i32
    %c0_i32_0 = arith.constant 0 : i32
    %c0_i32_1 = arith.constant 0 : i32
    return %c0_i32, %c0_i32_0 : i32, i32
  }
  func.func @transform_4(%arg0: i32) -> (i32, i32) {
    %c0_i32 = arith.constant 0 : i32
    %c0_i32_0 = arith.constant 0 : i32
    %c0_i32_1 = arith.constant 0 : i32
    return %c0_i32, %c0_i32_0 : i32, i32
  }
  func.func @transform_5(%arg0: i32) -> (i32, i32) {
    %c0_i32 = arith.constant 0 : i32
    %c0_i32_0 = arith.constant 0 : i32
    %c0_i32_1 = arith.constant 0 : i32
    return %c0_i32, %c0_i32_0 : i32, i32
  }
  func.func @transform_6(%arg0: i32) -> (i32, i32) {
    %c0_i32 = arith.constant 0 : i32
    %c0_i32_0 = arith.constant 0 : i32
    %c0_i32_1 = arith.constant 0 : i32
    return %c0_i32, %c0_i32_0 : i32, i32
  }
  func.func @transform_7(%arg0: i32) -> (i32, i32) {
    %c0_i32 = arith.constant 0 : i32
    %c0_i32_0 = arith.constant 0 : i32
    %c0_i32_1 = arith.constant 0 : i32
    return %c0_i32, %c0_i32_0 : i32, i32
  }
  func.func @transform_8(%arg0: i32) -> (i32, i32) {
    %c0_i32 = arith.constant 0 : i32
    %c0_i32_0 = arith.constant 0 : i32
    %c0_i32_1 = arith.constant 0 : i32
    return %c0_i32, %c0_i32_0 : i32, i32
  }
  func.func @transform_9(%arg0: i32) -> (i32, i32) {
    %c0_i32 = arith.constant 0 : i32
    %c0_i32_0 = arith.constant 0 : i32
    return %c0_i32, %arg0 : i32, i32
  }
}

</mosaic_0001>

<bundles_post_ra>
// kernel: pinn_forward.1
= control target key start
LH: loop header
LB: loop body
LE: loop exit
PB: predicated region body
PF: predicated region fallthrough
CT: control target
= control target key end

     0   :  { %v844_v0 = vmov 0   ;;  %v845_v5 = vmov 1   ;;  %v846_v14 = vmov 0.0   ;;  %vm847_vm0 = vmmov 0   ;;  %s1108_s1 = inlined_call_operand.vmem [shape: f32[50,2], index: 1, kind: input, shape index: {}]   ;;  %s1109_s8 = inlined_call_operand.<no memory space> [shape: f32[1,1], index: 8, kind: input, shape index: {}]   ;;  %s1110_s2 = inlined_call_operand.vmem [shape: f32[50,1], index: 2, kind: input, shape index: {}]   ;;  %s1111_s4 = inlined_call_operand.vmem [shape: f32[50,1], index: 4, kind: input, shape index: {}]   ;;  %s1112_s6 = inlined_call_operand.vmem [shape: f32[50,1], index: 6, kind: input, shape index: {}]   ;;  %s1113_s0 = inlined_call_operand.vmem [shape: f32[2,128], index: 0, kind: input, shape index: {}]   ;;  %s1114_s3 = inlined_call_operand.vmem [shape: f32[50,50], index: 3, kind: input, shape index: {}]   ;;  %s1115_s5 = inlined_call_operand.vmem [shape: f32[50,50], index: 5, kind: input, shape index: {}]   ;;  %s1116_s7 = inlined_call_operand.vmem [shape: f32[1,50], index: 7, kind: input, shape index: {}]   ;;  %s1117_s9 = inlined_call_operand.vmem [shape: f32[1,128], index: 9, kind: output, shape index: {}]  }
   0x1   :  { %793 = vset.pattern.permute.xlu1 %v844_v0  ;;  %792 = vset.pattern.permute.xlu0 %v844_v0  ;;  %v42_v1 = vld [vmem:[%s1108_s1 + $0x30] sm:$0x3]  ;;  %v41_v2 = vld [vmem:[%s1108_s1 + $0x28] sm:$0xff]  ;;  %v14_v3 = vstv %s1109_s8  ;;  %v39_v4 = vld [vmem:[%s1108_s1 + $0x18] sm:$0xff]  ;;  %vm262_vm1 = vcmask 1041408   ;;  %vm240_vm2 = vcmask 408576  }
   0x2   :  { %75 = vperm.xlu0 %792, %v42_v1   ;;  %70 = vperm.xlu1 %793, %v41_v2   ;;  %15 = vst [vmem:[#allocation2] sm:$0x1] %v14_v3  ;;  %v38_v6 = vld [vmem:[%s1108_s1 + $0x10] sm:$0xff]  ;;  %v40_v7 = vld [vmem:[%s1108_s1 + $0x20] sm:$0xff]  ;;  %v140_v10 = vld [vmem:[%s1110_s2 + $0x28] sm:$0xff] }
   0x3   :  { %v139_v8 = vld [vmem:[%s1110_s2 + $0x20] sm:$0xff]  ;;  %v141_v9 = vld [vmem:[%s1110_s2 + $0x30] sm:$0x3]  ;;  %v37_v11 = vld [vmem:[%s1108_s1 + $0x8] sm:$0xff]  ;;  %701 = vmatprep.subr.mxu0 %v846_v14  ;;  %736 = vmatprep.subr.mxu1 %v846_v14 }
   0x4   :  { %v36_v12 = vld [vmem:[%s1108_s1] sm:$0xff]  ;;  %v136_v13 = vld [vmem:[%s1110_s2 + $0x8] sm:$0xff]  ;;  %v138_v15 = vld [vmem:[%s1110_s2 + $0x18] sm:$0xff]  ;;  %715 = vmatprep.mubr.msk.f32.mxu0 %vm847_vm0, %v846_v14  ;;  %750 = vmatprep.mubr.msk.f32.mxu1 %vm847_vm0, %v846_v14 }
   0x5   :  { %v203_v16 = vld [vmem:[%s1111_s4 + $0x28] sm:$0xff]  ;;  %v201_v17 = vld [vmem:[%s1111_s4 + $0x18] sm:$0xff]  ;;  %v137_v19 = vld [vmem:[%s1110_s2 + $0x10] sm:$0xff] }
   0x6   :  { %794 = vset.pattern.permute.xlu1 %v845_v5  ;;  %60 = vperm.xlu0 %792, %v39_v4   ;;  %v199_v18 = vld [vmem:[%s1111_s4 + $0x8] sm:$0xff]  ;;  %v386_v20 = vld [vmem:[%s1112_s6 + $0x30] sm:$0x3]  ;;  %v135_v21 = vld [vmem:[%s1110_s2] sm:$0xff] }
   0x7   :  { %110 = vperm.xlu1 %794, %v41_v2   ;;  %v384_v22 = vld [vmem:[%s1112_s6 + $0x20] sm:$0xff]  ;;  %v204_v23 = vld [vmem:[%s1111_s4 + $0x30] sm:$0x3]  ;;  %v385_v29 = vld [vmem:[%s1112_s6 + $0x28] sm:$0xff] }
   0x8   :  { %v382_v24 = vld [vmem:[%s1112_s6 + $0x10] sm:$0xff]  ;;  %v202_v25 = vld [vmem:[%s1111_s4 + $0x20] sm:$0xff]  ;;  %v383_v30 = vld [vmem:[%s1112_s6 + $0x18] sm:$0xff] }
   0x9   :  { %v380_v26 = vld [vmem:[%s1112_s6] sm:$0xff]  ;;  %v200_v27 = vld [vmem:[%s1111_s4 + $0x10] sm:$0xff]  ;;  %v381_v31 = vld [vmem:[%s1112_s6 + $0x8] sm:$0xff] }
   0xa   :  { %55 = vperm.xlu0 %792, %v38_v6   ;;  %v198_v28 = vld [vmem:[%s1111_s4] sm:$0xff] }
   0xb   :  { %795 = vset.pattern.permute.xlu1 %v844_v0  ;;  %v554_v32 = vld [vmem:[#allocation2] sm:$0x1]  ;;  %v646_v41 = vld [vmem:[%s1113_s0 + $0x1] ss:$0 sm:$0xff] }
   0xc   :  { %65 = vperm.xlu1 %795, %v40_v7   ;;  %v645_v42 = vld [vmem:[%s1113_s0] ss:$0 sm:$0xff] }
   0xe   :  { %164 = vperm.xlu0 %792, %v139_v8  }
  0x10   :  { %174 = vperm.xlu1 %795, %v141_v9  }
  0x12   :  { %799 = vset.pattern.permute.xlu0 %v845_v5 }
  0x13   :  { %114 = vperm.xlu0 %799, %v42_v1  }
  0x14   :  { %796 = vset.pattern.permute.xlu1 %v845_v5 }
  0x15   :  { %102 = vperm.xlu1 %796, %v39_v4  }
  0x17   :  { %106 = vperm.xlu0 %799, %v40_v7  }
  0x19   :  { %797 = vset.pattern.permute.xlu1 %v844_v0 }
  0x1a   :  { %169 = vperm.xlu1 %797, %v140_v10  }
  0x1b   :  { %94 = vperm.xlu0 %799, %v37_v11  }
  0x1e   :  { %798 = vset.pattern.permute.xlu1 %v845_v5 }
  0x1f   :  { %98 = vperm.xlu1 %798, %v38_v6   ;;  %90 = vperm.xlu0 %799, %v36_v12  }
  0x23   :  { %800 = vset.pattern.permute.xlu1 %v844_v0  ;;  %801 = vset.pattern.permute.xlu0 %v844_v0 }
  0x24   :  { %50 = vperm.xlu1 %800, %v37_v11   ;;  %149 = vperm.xlu0 %801, %v136_v13  }
  0x28   :  { %159 = vperm.xlu1 %800, %v138_v15   ;;  %232 = vperm.xlu0 %801, %v203_v16  }
  0x2c   :  { %222 = vperm.xlu0 %801, %v201_v17   ;;  %45 = vperm.xlu1 %800, %v36_v12  }
  0x30   :  { %212 = vperm.xlu0 %801, %v199_v18   ;;  %154 = vperm.xlu1 %800, %v137_v19  }
  0x34   :  { %419 = vperm.xlu0 %801, %v386_v20   ;;  %144 = vperm.xlu1 %800, %v135_v21  }
  0x38   :  { %409 = vperm.xlu0 %801, %v384_v22   ;;  %237 = vperm.xlu1 %800, %v204_v23  }
  0x3c   :  { %399 = vperm.xlu0 %801, %v382_v24   ;;  %227 = vperm.xlu1 %800, %v202_v25  }
  0x40   :  { %389 = vperm.xlu0 %801, %v380_v26   ;;  %217 = vperm.xlu1 %800, %v200_v27   ;;  %v191_v27 = vld [vmem:[%s1114_s3] sm:$0xff] }
  0x44   :  { %207 = vperm.xlu1 %800, %v198_v28  }
  0x48   :  { %414 = vperm.xlu1 %800, %v385_v29   ;;  %v192_v29 = vld [vmem:[%s1114_s3 + $0x8] sm:$0xff] }
  0x4c   :  { %404 = vperm.xlu1 %800, %v383_v30   ;;  %v193_v30 = vld [vmem:[%s1114_s3 + $0x10] sm:$0xff] }
  0x50   :  { %394 = vperm.xlu1 %800, %v381_v31   ;;  %v194_v31 = vld [vmem:[%s1114_s3 + $0x18] sm:$0xff] }
  0x54   :  { %557 = vperm.xlu1 %800, %v554_v32   ;;  %v195_v32 = vld [vmem:[%s1114_s3 + $0x20] sm:$0xff] }
  0x7d   :  { %v71_v33 = vpop.permute.xlu1 %70  ;;  %v76_v34 = vpop.permute.xlu0 %75 }
  0x7e   :  { %v88_v44 = vmul.f32 %v645_v42, %v76_v34  ;;  %v87_v49 = vmul.f32 %v645_v42, %v71_v33  ;;  %v196_v33 = vld [vmem:[%s1114_s3 + $0x28] sm:$0xff]  ;;  %v197_v34 = vld [vmem:[%s1114_s3 + $0x30] sm:$0x3] }
  0x81   :  { %v61_v35 = vpop.permute.xlu0 %60 }
  0x82   :  { %v111_v36 = vpop.permute.xlu1 %110  ;;  %v85_v63 = vmul.f32 %v645_v42, %v61_v35 }
  0x83   :  { %v126_v46 = vmul.f32 %v646_v41, %v111_v36 }
  0x85   :  { %v56_v37 = vpop.permute.xlu0 %55  ;;  %v133_v54 = vadd.f32 %v126_v46, %v87_v49 }
  0x86   :  { %v84_v11 = vmul.f32 %v645_v42, %v56_v37 }
  0x87   :  { %v66_v38 = vpop.permute.xlu1 %65 }
  0x88   :  { %v86_v51 = vmul.f32 %v645_v42, %v66_v38 }
  0x89   :  { %v165_v39 = vpop.permute.xlu0 %164 }
  0x8b   :  { %v175_v40 = vpop.permute.xlu1 %174 }
  0x8e   :  { %v115_v43 = vpop.permute.xlu0 %114 }
  0x8f   :  { %v127_v45 = vmul.f32 %v646_v41, %v115_v43 }
  0x90   :  { %v103_v47 = vpop.permute.xlu1 %102 }
  0x91   :  { %v134_v48 = vadd.f32 %v127_v45, %v88_v44  ;;  %v124_v60 = vmul.f32 %v646_v41, %v103_v47 }
  0x92   :  { %v107_v50 = vpop.permute.xlu0 %106 }
  0x93   :  { %v183_v52 = vadd.f32 %v175_v40, %v134_v48  ;;  %v125_v53 = vmul.f32 %v646_v41, %v107_v50  ;;  %v131_v1 = vadd.f32 %v124_v60, %v85_v63 }
  0x95   :  { %802 = vtanh.f32 %v183_v52  ;;  %v132_v55 = vadd.f32 %v125_v53, %v86_v51  ;;  %v170_v56 = vpop.permute.xlu1 %169 }
  0x96   :  { %v182_v57 = vadd.f32 %v170_v56, %v133_v54  ;;  %v95_v61 = vpop.permute.xlu0 %94 }
  0x97   :  { %v181_v58 = vadd.f32 %v165_v39, %v132_v55  ;;  %v122_v8 = vmul.f32 %v646_v41, %v95_v61 }
  0x98   :  { %804 = vtanh.f32 %v182_v57 }
  0x99   :  { %806 = vtanh.f32 %v181_v58 }
  0x9a   :  { %v99_v59 = vpop.permute.xlu1 %98  ;;  %v91_v6 = vpop.permute.xlu0 %90 }
  0x9b   :  { %v123_v9 = vmul.f32 %v646_v41, %v99_v59  ;;  %v121_v18 = vmul.f32 %v646_v41, %v91_v6 }
  0x9d   :  { %v130_v15 = vadd.f32 %v123_v9, %v84_v11  ;;  %v376_v9 = vld [vmem:[%s1115_s5 + $0x18] sm:$0xff]  ;;  %v378_v11 = vld [vmem:[%s1115_s5 + $0x28] sm:$0xff] }
  0x9f   :  { %v51_v62 = vpop.permute.xlu1 %50  ;;  %v150_v16 = vpop.permute.xlu0 %149 }
  0xa0   :  { %v83_v3 = vmul.f32 %v645_v42, %v51_v62 }
  0xa2   :  { %v803_v0 = vpop.eup %802  ;;  %v129_v12 = vadd.f32 %v122_v8, %v83_v3  ;;  %v375_v8 = vld [vmem:[%s1115_s5 + $0x10] sm:$0xff] }
  0xa3   :  { %v160_v2 = vpop.permute.xlu1 %159  ;;  %702 = vmatpush3.msk.msra.mxu0 %vm262_vm1, %v803_v0  ;;  %v233_v46 = vpop.permute.xlu0 %232 }
  0xa4   :  { %v180_v4 = vadd.f32 %v160_v2, %v131_v1  ;;  %703 = vmatprep.subr.mxu0 %v846_v14  ;;  %v178_v19 = vadd.f32 %v150_v16, %v129_v12  ;;  %v379_v12 = vld [vmem:[%s1115_s5 + $0x30] sm:$0x3] }
  0xa5   :  { %v805_v5 = vpop.eup %804 }
  0xa6   :  { %v807_v7 = vpop.eup %806  ;;  %704 = vmatpush3.msra.mxu0 %v805_v5  ;;  %808 = vtanh.f32 %v180_v4  ;;  %v373_v5 = vld [vmem:[%s1115_s5] sm:$0xff] }
  0xa7   :  { %v46_v10 = vpop.permute.xlu1 %45  ;;  %705 = vmatprep.subr.mxu0 %v846_v14  ;;  %v223_v53 = vpop.permute.xlu0 %222 }
  0xa8   :  { %706 = vmatpush3.msra.mxu0 %v807_v7  ;;  %v82_v13 = vmul.f32 %v645_v42, %v46_v10  ;;  %v374_v7 = vld [vmem:[%s1115_s5 + $0x8] sm:$0xff]  ;;  %v377_v10 = vld [vmem:[%s1115_s5 + $0x20] sm:$0xff] }
  0xa9   :  { %707 = vmatprep.subr.mxu0 %v846_v14 }
  0xaa   :  { %v128_v21 = vadd.f32 %v121_v18, %v82_v13 }
  0xab   :  { %v155_v17 = vpop.permute.xlu1 %154  ;;  %v213_v59 = vpop.permute.xlu0 %212 }
  0xac   :  { %v179_v20 = vadd.f32 %v155_v17, %v130_v15 }
  0xae   :  { %810 = vtanh.f32 %v179_v20 }
  0xaf   :  { %v145_v22 = vpop.permute.xlu1 %144  ;;  %812 = vtanh.f32 %v178_v19 }
  0xb0   :  { %v177_v23 = vadd.f32 %v145_v22, %v128_v21  ;;  %v420_v22 = vpop.permute.xlu0 %419 }
  0xb2   :  { %814 = vtanh.f32 %v177_v23 }
  0xb3   :  { %v809_v24 = vpop.eup %808  ;;  %v238_v43 = vpop.permute.xlu1 %237 }
  0xb4   :  { %708 = vmatpush3.msra.mxu0 %v809_v24 }
  0xb5   :  { %709 = vmatprep.subr.mxu0 %v846_v14 }
  0xb7   :  { %v228_v48 = vpop.permute.xlu1 %227 }
  0xbb   :  { %v811_v25 = vpop.eup %810  ;;  %v218_v56 = vpop.permute.xlu1 %217 }
  0xbc   :  { %710 = vmatpush3.msra.mxu0 %v811_v25  ;;  %v813_v26 = vpop.eup %812 }
  0xbd   :  { %711 = vmatprep.subr.mxu0 %v846_v14 }
  0xbe   :  { %712 = vmatpush3.msra.mxu0 %v813_v26 }
  0xbf   :  { %v815_v28 = vpop.eup %814  ;;  %713 = vmatprep.subr.mxu0 %v846_v14  ;;  %v208_v61 = vpop.permute.xlu1 %207 }
  0xc0   :  { %714 = vmatpush3.msra.mxu0 %v815_v28 }
  0xc1   :  { %716 = vmatmul.mubr.msk.f32.vlgmr.msra.gmra.mxu0 %vm240_vm2, %v191_v27  ;;  %771 = vmatprep.subr.mxu0 %v846_v14  ;;  %v410_v27 = vpop.permute.xlu0 %409 }
  0xc2   :  { %718 = vmatprep.mubr.msk.f32.mxu0 %vm847_vm0, %v846_v14 }
  0xc3   :  { %v415_v25 = vpop.permute.xlu1 %414 }
  0xc5   :  { %719 = vmatmul.mubr.msk.f32.gmra.mxu0 %vm240_vm2, %v192_v29 }
  0xc6   :  { %721 = vmatprep.mubr.msk.f32.mxu0 %vm847_vm0, %v846_v14 }
  0xc9   :  { %722 = vmatmul.mubr.msk.f32.gmra.mxu0 %vm240_vm2, %v193_v30 }
  0xca   :  { %724 = vmatprep.mubr.msk.f32.mxu0 %vm847_vm0, %v846_v14 }
  0xcd   :  { %725 = vmatmul.mubr.msk.f32.gmra.mxu0 %vm240_vm2, %v194_v31 }
  0xce   :  { %727 = vmatprep.mubr.msk.f32.mxu0 %vm847_vm0, %v846_v14 }
  0xd1   :  { %728 = vmatmul.mubr.msk.f32.gmra.mxu0 %vm240_vm2, %v195_v32  ;;  %v405_v32 = vpop.permute.xlu1 %404 }
  0xd2   :  { %730 = vmatprep.mubr.msk.f32.mxu0 %vm847_vm0, %v846_v14 }
  0xd5   :  { %731 = vmatmul.mubr.msk.f32.gmra.mxu0 %vm240_vm2, %v196_v33 }
  0xd6   :  { %733 = vmatprep.mubr.msk.f32.mxu0 %vm847_vm0, %v846_v14 }
  0xd9   :  { %734 = vmatmul.mubr.msk.f32.gmra.mxu0 %vm240_vm2, %v197_v34 }
  0xda   :  { %785 = vmatprep.mubr.msk.f32.mxu0 %vm847_vm0, %v846_v14 }
 0x181   :  { %v332_v35 = vpop.f32.mrf.mxu0 }
 0x182   :  { %v333_v62 = vadd.f32 %v332_v35, %v208_v61  ;;  %v400_v35 = vpop.permute.xlu0 %399 }
 0x183   :  { %v717_v36 = vpop.f32.mrf.mxu0 }
 0x185   :  { %v337_v37 = vpop.f32.mrf.mxu0 }
 0x186   :  { %v338_v60 = vadd.f32 %v337_v37, %v213_v59 }
 0x187   :  { %v720_v38 = vpop.f32.mrf.mxu0 }
 0x188   :  { %v395_v38 = vpop.permute.xlu1 %394 }
 0x189   :  { %v342_v39 = vpop.f32.mrf.mxu0 }
 0x18a   :  { %v343_v58 = vadd.f32 %v342_v39, %v218_v56 }
 0x18b   :  { %v723_v40 = vpop.f32.mrf.mxu0 }
 0x18c   :  { %v390_v40 = vpop.permute.xlu0 %389 }
 0x18d   :  { %v347_v41 = vpop.f32.mrf.mxu0 }
 0x18e   :  { %v348_v57 = vadd.f32 %v347_v41, %v223_v53  ;;  %v558_v53 = vpop.permute.xlu1 %557 }
 0x18f   :  { %v726_v42 = vpop.f32.mrf.mxu0 }
 0x191   :  { %v352_v44 = vpop.f32.mrf.mxu0 }
 0x192   :  { %v353_v55 = vadd.f32 %v352_v44, %v228_v48  ;;  %v553_v48 = vld [vmem:[%s1116_s7] sm:$0x1] }
 0x193   :  { %v729_v45 = vpop.f32.mrf.mxu0 }
 0x195   :  { %v357_v47 = vpop.f32.mrf.mxu0 }
 0x196   :  { %v358_v51 = vadd.f32 %v357_v47, %v233_v46 }
 0x197   :  { %v732_v49 = vpop.f32.mrf.mxu0 }
 0x199   :  { %v362_v50 = vpop.f32.mrf.mxu0 }
 0x19a   :  { %v363_v52 = vadd.f32 %v362_v50, %v238_v43  ;;  %v560_v50 = vlaneseq }
 0x19b   :  { %v735_v54 = vpop.f32.mrf.mxu0 }
 0x19c   :  { %816 = vtanh.f32 %v363_v52 }
 0x19d   :  { %818 = vtanh.f32 %v358_v51  ;;  %v561_v51 = vshrl.u32 %v560_v50, 7 }
 0x19e   :  { %820 = vtanh.f32 %v353_v55 }
 0x19f   :  { %822 = vtanh.f32 %v348_v57  ;;  %v562_v52 = vsub.s32 0, %v561_v51 }
 0x1a0   :  { %824 = vtanh.f32 %v343_v58 }
 0x1a1   :  { %826 = vtanh.f32 %v338_v60  ;;  %v563_v54 = vrot.slane %v558_v53, %v562_v52 }
 0x1a2   :  { %828 = vtanh.f32 %v333_v62 }
 0x1a9   :  { %v817_v63 = vpop.eup %816 }
 0x1aa   :  { %737 = vmatpush3.msk.msra.mxu1 %vm262_vm1, %v817_v63  ;;  %v819_v0 = vpop.eup %818 }
 0x1ab   :  { %738 = vmatprep.subr.mxu1 %v846_v14  ;;  %v821_v1 = vpop.eup %820 }
 0x1ac   :  { %739 = vmatpush3.msra.mxu1 %v819_v0  ;;  %v823_v2 = vpop.eup %822 }
 0x1ad   :  { %740 = vmatprep.subr.mxu1 %v846_v14  ;;  %v825_v3 = vpop.eup %824 }
 0x1ae   :  { %741 = vmatpush3.msra.mxu1 %v821_v1  ;;  %v827_v4 = vpop.eup %826 }
 0x1af   :  { %742 = vmatprep.subr.mxu1 %v846_v14  ;;  %v829_v6 = vpop.eup %828 }
 0x1b0   :  { %743 = vmatpush3.msra.mxu1 %v823_v2 }
 0x1b1   :  { %744 = vmatprep.subr.mxu1 %v846_v14 }
 0x1b2   :  { %745 = vmatpush3.msra.mxu1 %v825_v3 }
 0x1b3   :  { %746 = vmatprep.subr.mxu1 %v846_v14 }
 0x1b4   :  { %747 = vmatpush3.msra.mxu1 %v827_v4 }
 0x1b5   :  { %748 = vmatprep.subr.mxu1 %v846_v14 }
 0x1b6   :  { %749 = vmatpush3.msra.mxu1 %v829_v6 }
 0x1b7   :  { %751 = vmatmul.mubr.msk.f32.vlgmr.msra.gmra.mxu1 %vm240_vm2, %v373_v5 }
 0x1b8   :  { %753 = vmatprep.mubr.msk.f32.mxu1 %vm847_vm0, %v846_v14 }
 0x1bb   :  { %754 = vmatmul.mubr.msk.f32.gmra.mxu1 %vm240_vm2, %v374_v7 }
 0x1bc   :  { %756 = vmatprep.mubr.msk.f32.mxu1 %vm847_vm0, %v846_v14 }
 0x1bf   :  { %757 = vmatmul.mubr.msk.f32.gmra.mxu1 %vm240_vm2, %v375_v8 }
 0x1c0   :  { %759 = vmatprep.mubr.msk.f32.mxu1 %vm847_vm0, %v846_v14 }
 0x1c3   :  { %760 = vmatmul.mubr.msk.f32.gmra.mxu1 %vm240_vm2, %v376_v9 }
 0x1c4   :  { %762 = vmatprep.mubr.msk.f32.mxu1 %vm847_vm0, %v846_v14 }
 0x1c7   :  { %763 = vmatmul.mubr.msk.f32.gmra.mxu1 %vm240_vm2, %v377_v10 }
 0x1c8   :  { %765 = vmatprep.mubr.msk.f32.mxu1 %vm847_vm0, %v846_v14 }
 0x1cb   :  { %766 = vmatmul.mubr.msk.f32.gmra.mxu1 %vm240_vm2, %v378_v11 }
 0x1cc   :  { %768 = vmatprep.mubr.msk.f32.mxu1 %vm847_vm0, %v846_v14 }
 0x1cf   :  { %769 = vmatmul.mubr.msk.f32.gmra.mxu1 %vm240_vm2, %v379_v12 }
 0x277   :  { %v512_v13 = vpop.f32.mrf.mxu1 }
 0x278   :  { %v513_v41 = vadd.f32 %v512_v13, %v390_v40 }
 0x279   :  { %v752_v15 = vpop.f32.mrf.mxu1 }
 0x27b   :  { %v517_v16 = vpop.f32.mrf.mxu1 }
 0x27c   :  { %v518_v39 = vadd.f32 %v517_v16, %v395_v38 }
 0x27d   :  { %v755_v17 = vpop.f32.mrf.mxu1 }
 0x27f   :  { %v522_v18 = vpop.f32.mrf.mxu1 }
 0x280   :  { %v523_v37 = vadd.f32 %v522_v18, %v400_v35 }
 0x281   :  { %v758_v19 = vpop.f32.mrf.mxu1 }
 0x283   :  { %v527_v20 = vpop.f32.mrf.mxu1 }
 0x284   :  { %v528_v36 = vadd.f32 %v527_v20, %v405_v32 }
 0x285   :  { %v761_v21 = vpop.f32.mrf.mxu1 }
 0x287   :  { %v532_v23 = vpop.f32.mrf.mxu1 }
 0x288   :  { %v533_v34 = vadd.f32 %v532_v23, %v410_v27 }
 0x289   :  { %v764_v24 = vpop.f32.mrf.mxu1 }
 0x28b   :  { %v537_v26 = vpop.f32.mrf.mxu1 }
 0x28c   :  { %v538_v30 = vadd.f32 %v537_v26, %v415_v25 }
 0x28d   :  { %v767_v28 = vpop.f32.mrf.mxu1 }
 0x28f   :  { %v542_v29 = vpop.f32.mrf.mxu1 }
 0x290   :  { %v543_v31 = vadd.f32 %v542_v29, %v420_v22 }
 0x291   :  { %v770_v33 = vpop.f32.mrf.mxu1 }
 0x292   :  { %830 = vtanh.f32 %v543_v31 }
 0x293   :  { %832 = vtanh.f32 %v538_v30 }
 0x294   :  { %834 = vtanh.f32 %v533_v34 }
 0x295   :  { %836 = vtanh.f32 %v528_v36 }
 0x296   :  { %838 = vtanh.f32 %v523_v37 }
 0x297   :  { %840 = vtanh.f32 %v518_v39 }
 0x298   :  { %842 = vtanh.f32 %v513_v41 }
 0x29f   :  { %v831_v42 = vpop.eup %830 }
 0x2a0   :  { %772 = vmatpush3.msk.msra.mxu0 %vm262_vm1, %v831_v42  ;;  %v833_v43 = vpop.eup %832 }
 0x2a1   :  { %773 = vmatprep.subr.mxu0 %v846_v14  ;;  %v835_v44 = vpop.eup %834 }
 0x2a2   :  { %774 = vmatpush3.msra.mxu0 %v833_v43  ;;  %v837_v45 = vpop.eup %836 }
 0x2a3   :  { %775 = vmatprep.subr.mxu0 %v846_v14  ;;  %v839_v46 = vpop.eup %838 }
 0x2a4   :  { %776 = vmatpush3.msra.mxu0 %v835_v44  ;;  %v841_v47 = vpop.eup %840 }
 0x2a5   :  { %777 = vmatprep.subr.mxu0 %v846_v14  ;;  %v843_v49 = vpop.eup %842 }
 0x2a6   :  { %778 = vmatpush3.msra.mxu0 %v837_v45 }
 0x2a7   :  { %779 = vmatprep.subr.mxu0 %v846_v14 }
 0x2a8   :  { %780 = vmatpush3.msra.mxu0 %v839_v46 }
 0x2a9   :  { %781 = vmatprep.subr.mxu0 %v846_v14 }
 0x2aa   :  { %782 = vmatpush3.msra.mxu0 %v841_v47 }
 0x2ab   :  { %783 = vmatprep.subr.mxu0 %v846_v14 }
 0x2ac   :  { %784 = vmatpush3.msra.mxu0 %v843_v49 }
 0x2ad   :  { %786 = vmatmul.mubr.msk.f32.vlgmr.msra.gmra.mxu0 %vm240_vm2, %v553_v48 }
 0x36d   :  { %v636_v55 = vpop.f32.mrf.mxu0 }
 0x36e   :  { %v637_v56 = vadd.f32 %v636_v55, %v563_v54 }
 0x36f   :  { %v787_v57 = vpop.f32.mrf.mxu0 }
 0x370   :  { %640 = vst [vmem:[%s1117_s9] sm:$0x1] %v637_v56 }

</bundles_post_ra>
